<compile_context>
chip_gen: v7x
topology: tpu7x:2x2x1
jax: 0.10.0
libtpu: 0.0.40
codegen_flags: <defaults>
</compile_context>

<pallas_src>
import functools

import jax
import jax.numpy as jnp
from jax.experimental import pallas as pl
from jax.experimental.pallas import tpu as pltpu


def _huber_partial_kernel(yt_ref, yp_ref, out_ref, *, n_rows, tile_rows, slab_rows):
    """Writes one (1, lane_width) per-lane partial Huber-loss sum per grid block."""
    i = pl.program_id(0)
    lane_width = out_ref.shape[-1]
    n_slabs = tile_rows // slab_rows

    def partial_sum(masked):
        def body(s, acc):
            r0 = pl.multiple_of(s * slab_rows, slab_rows)
            # Native-dtype loads; f32 math (v5e VPU is f32-only).
            yt = yt_ref[pl.ds(r0, slab_rows), :].astype(jnp.float32)
            yp = yp_ref[pl.ds(r0, slab_rows), :].astype(jnp.float32)
            err = yt - yp
            a = jnp.abs(err)
            c = jnp.minimum(a, 1.0)
            loss = c * (a - 0.5 * c)  # == where(|err|<1, 0.5*err^2, |err|-0.5)
            if masked:
                # Rows past the end of the (un-padded) array hold undefined
                # data from the over-read last block: select them to 0.
                row = jax.lax.broadcasted_iota(jnp.int32, loss.shape, 0)
                valid = (i * tile_rows + r0 + row) < n_rows
                loss = jnp.where(valid, loss, 0.0)
            return acc + jnp.sum(loss, axis=0, keepdims=True)

        init = jnp.zeros((1, lane_width), jnp.float32)
        return jax.lax.fori_loop(0, n_slabs, body, init, unroll=True)

    if n_rows % tile_rows == 0:
        # Every block is full: single unmasked fast path (no iota/select).
        out_ref[0] = partial_sum(masked=False)
    else:
        last = pl.num_programs(0) - 1

        @pl.when(i != last)
        def _():
            out_ref[0] = partial_sum(masked=False)

        @pl.when(i == last)
        def _():
            out_ref[0] = partial_sum(masked=True)


def _round_up(x, m):
    return ((x + m - 1) // m) * m


def _sublane_pack(dtype):
    # 8 rows for 4-byte dtypes, 16 for 2-byte, 32 for 1-byte (sublane packing).
    return max(8, 32 // jnp.dtype(dtype).itemsize)


def huber_loss(y_true, y_pred, *, target_block_bytes=4 << 20, slab_rows=256):
    """Scalar Huber loss (mean of elementwise Huber), matching the PyTorch module."""
    assert y_true.shape == y_pred.shape, "y_true and y_pred must have the same shape"

    total = y_true.size
    if total == 0:  # torch.mean over an empty tensor is NaN
        return jnp.array(jnp.nan, jnp.float32)

    # Free (layout-preserving) flatten; no dtype promotion in HBM.
    yt = y_true.reshape(-1)
    yp = y_pred.reshape(-1)

    # Lane-dense 2D view without copying: widest lane count dividing the size.
    lane_width = next((lw for lw in (512, 256, 128) if total % lw == 0), None)
    padded_total = total
    if lane_width is None:
        # TODO(synk): a 1-D tail kernel would avoid this (rare) copying pad.
        lane_width = 128
        padded_total = _round_up(total, lane_width)
        yt = jnp.pad(yt, (0, padded_total - total))  # zeros -> zero loss
        yp = jnp.pad(yp, (0, padded_total - total))
    n_rows = padded_total // lane_width
    yt = yt.reshape(n_rows, lane_width)
    yp = yp.reshape(n_rows, lane_width)

    # --- tile sizing --------------------------------------------------------
    pack = max(_sublane_pack(yt.dtype), _sublane_pack(yp.dtype))
    itemsize = max(jnp.dtype(yt.dtype).itemsize, jnp.dtype(yp.dtype).itemsize)

    slab_rows = max(pack, (slab_rows // pack) * pack)        # strip-mine slab
    slab_rows = min(slab_rows, _round_up(n_rows, pack))

    # ~target_block_bytes of HBM per input per grid step, a multiple of slab_rows.
    target_rows = max(1, (target_block_bytes // (lane_width * itemsize)) // slab_rows)
    target_rows *= slab_rows
    rows_round = _round_up(n_rows, slab_rows)
    tile_rows = min(target_rows, rows_round)
    if n_rows > slab_rows:
        # Guarantee >= 2 grid blocks so "parallel" can span both v7x TensorCores.
        tile_rows = min(tile_rows, _round_up(pl.cdiv(n_rows, 2), slab_rows))
    num_blocks = pl.cdiv(n_rows, tile_rows)
    if num_blocks == 1 and tile_rows > n_rows:
        # Single block: use the exact full-dim row count instead of over-reading.
        tile_rows = slab_rows = n_rows
    del pack

    kernel = functools.partial(
        _huber_partial_kernel,
        n_rows=n_rows, tile_rows=tile_rows, slab_rows=slab_rows)

    partials = pl.pallas_call(
        kernel,
        out_shape=jax.ShapeDtypeStruct((num_blocks, 1, lane_width), jnp.float32),
        grid_spec=pltpu.PrefetchScalarGridSpec(
            num_scalar_prefetch=0,
            grid=(num_blocks,),
            in_specs=[
                pl.BlockSpec((tile_rows, lane_width), lambda i: (i, 0)),
                pl.BlockSpec((tile_rows, lane_width), lambda i: (i, 0)),
            ],
            out_specs=pl.BlockSpec((1, 1, lane_width), lambda i: (i, 0, 0)),
        ),
        compiler_params=pltpu.CompilerParams(
            dimension_semantics=("parallel",),  # independent blocks -> dual-TC on v7x
            vmem_limit_bytes=32 * 1024 * 1024,
        ),
    )(yt, yp)

    # Tiny cross-block reduction + mean (divide by the *un-padded* count).
    return jnp.sum(partials) / total


if __name__ == "__main__":
    key = jax.random.PRNGKey(0)
    ks = jax.random.split(key, 8)

    def ref_loss(yt, yp):
        err = yt.astype(jnp.float32) - yp.astype(jnp.float32)
        a = jnp.abs(err)
        return jnp.mean(jnp.where(a < 1.0, 0.5 * err * err, a - 0.5))

    # 1) DQN-like Q-value tensors (batch, width): lane-aligned fast path.
    yt = jax.random.normal(ks[0], (32, 128), jnp.float32) * 2.0
    yp = jax.random.normal(ks[1], (32, 128), jnp.float32) * 2.0
    out = jax.block_until_ready(huber_loss(yt, yp))
    assert jnp.allclose(out, ref_loss(yt, yp), rtol=1e-5, atol=1e-6), (out, ref_loss(yt, yp))

    # 2) rows not a multiple of the sublane pack: exact full-dim single block.
    yt = jax.random.normal(ks[2], (40, 64), jnp.float32) * 3.0
    yp = jax.random.normal(ks[3], (40, 64), jnp.float32) * 3.0
    out = jax.block_until_ready(huber_loss(yt, yp))
    assert jnp.allclose(out, ref_loss(yt, yp), rtol=1e-5, atol=1e-6), (out, ref_loss(yt, yp))

    # 3) multi-block grid (small knobs) + mixed dtypes (no wrapper promotion).
    yt = jax.random.normal(ks[4], (128, 128), jnp.float32) * 2.0
    yp = (jax.random.normal(ks[5], (128, 128), jnp.float32) * 2.0).astype(jnp.bfloat16)
    out = jax.block_until_ready(huber_loss(yt, yp, target_block_bytes=4096, slab_rows=16))
    assert jnp.allclose(out, ref_loss(yt, yp), rtol=1e-5, atol=1e-6), (out, ref_loss(yt, yp))

    # 4) multi-block grid with a ragged, in-kernel-masked last block.
    yt = jax.random.normal(ks[6], (40, 512), jnp.float32) * 2.0
    yp = jax.random.normal(ks[7], (40, 512), jnp.float32) * 2.0
    out = jax.block_until_ready(huber_loss(yt, yp, target_block_bytes=1 << 15, slab_rows=8))
    assert jnp.allclose(out, ref_loss(yt, yp), rtol=1e-5, atol=1e-6), (out, ref_loss(yt, yp))

    print("KERNEL_OK")
</pallas_src>

<mosaic_0001>
module attributes {stable_mosaic.version = 11 : i64} {
  func.func @_huber_partial_kernel(%arg0: i32, %arg1: memref<8x512xf32, #tpu.memory_space<vmem>>, %arg2: memref<8x512xf32, #tpu.memory_space<vmem>>, %arg3: memref<1x1x512xf32, #tpu.memory_space<vmem>>) attributes {dimension_semantics = [#tpu.dimension_semantics<parallel>], iteration_bounds = array<i64: 1>, scalar_prefetch = 0 : i64, scratch_operands = 0 : i64, tpu.core_type = #tpu.core_type<tc>, window_params = [{transform_indices = @transform_0, window_bounds = array<i64: 8, 512>}, {transform_indices = @transform_1, window_bounds = array<i64: 8, 512>}, {transform_indices = @transform_2, window_bounds = array<i64: 1, 1, 512>}]} {
    %cst = arith.constant 0.000000e+00 : f32
    %0 = vector.broadcast %cst : f32 to vector<1x512xf32>
    %c0_i32 = arith.constant 0 : i32
    %c8_i32 = arith.constant 8 : i32
    %1 = arith.muli %c0_i32, %c8_i32 : i32
    %2 = tpu.assume_multiple %1, 8 : i32
    %3 = arith.index_cast %2 : i32 to index
    %c0 = arith.constant 0 : index
    %4 = vector.load %arg1[%3, %c0] : memref<8x512xf32, #tpu.memory_space<vmem>>, vector<8x512xf32>
    %5 = arith.index_cast %2 : i32 to index
    %c0_0 = arith.constant 0 : index
    %6 = vector.load %arg2[%5, %c0_0] : memref<8x512xf32, #tpu.memory_space<vmem>>, vector<8x512xf32>
    %7 = arith.subf %4, %6 : vector<8x512xf32>
    %8 = math.absf %7 : vector<8x512xf32>
    %cst_1 = arith.constant 1.000000e+00 : f32
    %9 = vector.broadcast %cst_1 : f32 to vector<8x512xf32>
    %10 = arith.minimumf %8, %9 : vector<8x512xf32>
    %cst_2 = arith.constant 5.000000e-01 : f32
    %11 = vector.broadcast %cst_2 : f32 to vector<8x512xf32>
    %12 = arith.mulf %11, %10 : vector<8x512xf32>
    %13 = arith.subf %8, %12 : vector<8x512xf32>
    %14 = arith.mulf %10, %13 : vector<8x512xf32>
    %cst_3 = arith.constant dense<0.000000e+00> : vector<512xf32>
    %15 = vector.multi_reduction <add>, %14, %cst_3 [0] : vector<8x512xf32> to vector<512xf32>
    %16 = vector.shape_cast %15 : vector<512xf32> to vector<1x512xf32>
    %17 = arith.addf %0, %16 : vector<1x512xf32>
    %c1_i32 = arith.constant 1 : i32
    %c0_4 = arith.constant 0 : index
    %c0_5 = arith.constant 0 : index
    %c0_6 = arith.constant 0 : index
    %18 = vector.load %arg3[%c0_4, %c0_5, %c0_6] : memref<1x1x512xf32, #tpu.memory_space<vmem>>, vector<1x1x512xf32>
    %19 = vector.shape_cast %18 : vector<1x1x512xf32> to vector<1x512xf32>
    %20 = vector.shape_cast %17 : vector<1x512xf32> to vector<1x1x512xf32>
    tpu.vector_store %arg3[%c0_4, %c0_5, %c0_6], %20 {strides = array<i32>} : memref<1x1x512xf32, #tpu.memory_space<vmem>>, vector<1x1x512xf32>,
    return
  }
  func.func @transform_0(%arg0: i32) -> (i32, i32) {
    %c0_i32 = arith.constant 0 : i32
    %c0_i32_0 = arith.constant 0 : i32
    return %arg0, %c0_i32 : i32, i32
  }
  func.func @transform_1(%arg0: i32) -> (i32, i32) {
    %c0_i32 = arith.constant 0 : i32
    %c0_i32_0 = arith.constant 0 : i32
    return %arg0, %c0_i32 : i32, i32
  }
  func.func @transform_2(%arg0: i32) -> (i32, i32, i32) {
    %c0_i32 = arith.constant 0 : i32
    %c0_i32_0 = arith.constant 0 : i32
    %c0_i32_1 = arith.constant 0 : i32
    return %arg0, %c0_i32, %c0_i32_0 : i32, i32, i32
  }
}

</mosaic_0001>

<bundles_post_ra>
// kernel: tpu_custom_call.1
= control target key start
LH: loop header
LB: loop body
LE: loop exit
PB: predicated region body
PF: predicated region fallthrough
CT: control target
= control target key end

     0   :  { %7 = vsyncpa [#allocation3], 0  ;;  %s282_s0 = inlined_call_operand.hbm [shape: f32[8,512], index: 0, kind: input, shape index: {}]   ;;  %s283_s1 = inlined_call_operand.hbm [shape: f32[8,512], index: 1, kind: input, shape index: {}]   ;;  %s284_s2 = inlined_call_operand.hbm [shape: f32[1,1,512], index: 2, kind: output, shape index: {}]  }
   0x1   :  { %8 = vsyncpa [#allocation6], 0 }
   0x2   :  { %9 = vsyncpa [#allocation4], 0  ;;  %s227_s9 = smov [#allocation2]   ;;  %s228_s11 = smov [#allocation5]  }
   0x3   :  { %s16_s10 = sshll.u32 %s227_s9, 4  ;;  %s26_s12 = sshll.u32 %s228_s11, 4  ;;  %s17_s10 = int_to_ptr.vmem [resolvable:$true] %s16_s10  ;;  %s27_s12 = int_to_ptr.vmem [resolvable:$true] %s26_s12 }
   0x4   :  { %s155_s15 = scalar_lea.hbm %s282_s0, 512 }
   0x5   :  { %p156_p0 = scmp.ne.s32.totalorder %s282_s0, %s155_s15  ;;  %p159_p1 = scmp.lt.u32.totalorder %s155_s15, %s282_s0 }
   0x7   :  { %p161_p2 = pnand %p159_p1, %p156_p0 }
   0x9   :  { %164 = shalt.err (!%p161_p2)
}
   0xa   :  { %s165_s20 = scalar_lea.vmem %s17_s10, 512  ;;  %p170_p4 = scmp.lt.s32.totalorder %s17_s10, %s17_s10 }
   0xb   :  { %p166_p3 = scmp.ne.s32.totalorder %s17_s10, %s165_s20  ;;  %p171_p5 = scmp.lt.s32.totalorder %s165_s20, %s165_s20 }
   0xd   :  { %p172_p6 = por %p171_p5, %p170_p4 }
   0xf   :  { %p173_p7 = pnand %p172_p6, %p166_p3 }
  0x11   :  { %176 = shalt.err (!%p173_p7)
}
  0x12   :  { %19 = dma.hbm_to_vmem [thread:$0]  %s282_s0, 512, %s17_s10, [#allocation3]  }
  0x13   :  { %s177_s25 = scalar_lea.hbm %s283_s1, 512 }
  0x14   :  { %p178_p8 = scmp.ne.s32.totalorder %s283_s1, %s177_s25  ;;  %p181_p9 = scmp.lt.u32.totalorder %s177_s25, %s283_s1 }
  0x16   :  { %p183_p10 = pnand %p181_p9, %p178_p8 }
  0x18   :  { %186 = shalt.err (!%p183_p10)
}
  0x19   :  { %s187_s30 = scalar_lea.vmem %s27_s12, 512  ;;  %p192_p12 = scmp.lt.s32.totalorder %s27_s12, %s27_s12 }
  0x1a   :  { %p188_p11 = scmp.ne.s32.totalorder %s27_s12, %s187_s30  ;;  %p193_p13 = scmp.lt.s32.totalorder %s187_s30, %s187_s30 }
  0x1c   :  { %p194_p0 = por %p193_p13, %p192_p12 }
  0x1e   :  { %p195_p1 = pnand %p194_p0, %p188_p11 }
  0x20   :  { %198 = shalt.err (!%p195_p1)
}
  0x21   :  { %29 = dma.hbm_to_vmem [thread:$0]  %s283_s1, 512, %s27_s12, [#allocation6]  }
  0x22   :  { %221 = dma.done.wait [#allocation3], 512  }
  0x23   :  { %222 = vsyncadd [#allocation3], 4294966784 }
  0x24   :  { %223 = dma.done.wait [#allocation6], 512  }
  0x25   :  { %224 = vsyncadd [#allocation6], 4294966784  ;;  %v39_v0 = vld [vmem:[#allocation2] sm:$0xff]  ;;  %v40_v1 = vld [vmem:[#allocation2 + $0x8] sm:$0xff]  ;;  %v229_v38 = vmov 1966171168   ;;  %v110_v40 = vlaneseq }
  0x26   :  { %v41_v2 = vld [vmem:[#allocation2 + $0x10] sm:$0xff]  ;;  %v42_v3 = vld [vmem:[#allocation2 + $0x18] sm:$0xff]  ;;  %v45_v4 = vld [vmem:[#allocation5] sm:$0xff]  ;;  %v108_v39 = vunpack.c.l.s4 %v229_v38  ;;  %s230_s1 = smov [#allocation7]  }
  0x27   :  { %v46_v5 = vld [vmem:[#allocation5 + $0x8] sm:$0xff]  ;;  %v47_v6 = vld [vmem:[#allocation5 + $0x10] sm:$0xff]  ;;  %v48_v7 = vld [vmem:[#allocation5 + $0x18] sm:$0xff]  ;;  %v49_v8 = vsub.f32 %v39_v0, %v45_v4  ;;  %v111_v50 = vshrl.u32 %v110_v40, 7  ;;  %s141_s4 = sshll.u32 %s230_s1, 4  ;;  %vm132_vm0 = vcmp.lt.s32.totalorder %v110_v40, 512  ;;  %s142_s4 = int_to_ptr.vmem [resolvable:$true] %s141_s4 }
  0x28   :  { %v50_v9 = vsub.f32 %v40_v1, %v46_v5  ;;  %v51_v10 = vsub.f32 %v41_v2, %v47_v6  ;;  %v52_v11 = vsub.f32 %v42_v3, %v48_v7  ;;  %v109_v49 = vunpack.c.0.s8 %v108_v39  ;;  %s199_s5 = scalar_lea.vmem %s142_s4, 64  ;;  %p204_p3 = scmp.lt.s32.totalorder %s142_s4, %s142_s4 }
  0x29   :  { %v53_v12 = vand.u32 2147483647, %v49_v8  ;;  %p200_p2 = scmp.ne.s32.totalorder %s142_s4, %s199_s5  ;;  %p205_p4 = scmp.lt.s32.totalorder %s199_s5, %s199_s5 }
  0x2a   :  { %v54_v13 = vand.u32 2147483647, %v50_v9  ;;  %v55_v14 = vand.u32 2147483647, %v51_v10  ;;  %v56_v15 = vand.u32 2147483647, %v52_v11  ;;  %v112_v59 = vsub.s32 %v109_v49, %v111_v50 }
  0x2b   :  { %v57_v16 = vmin.f32 %v53_v12, 1.0  ;;  %p206_p5 = por %p205_p4, %p204_p3 }
  0x2c   :  { %v58_v17 = vmin.f32 %v54_v13, 1.0  ;;  %v59_v18 = vmin.f32 %v55_v14, 1.0  ;;  %v60_v19 = vmin.f32 %v56_v15, 1.0 }
  0x2d   :  { %v61_v20 = vmul.f32 0.5, %v57_v16  ;;  %p207_p6 = pnand %p206_p5, %p200_p2 }
  0x2e   :  { %v62_v21 = vmul.f32 0.5, %v58_v17  ;;  %v63_v22 = vmul.f32 0.5, %v59_v18  ;;  %v64_v23 = vmul.f32 0.5, %v60_v19 }
  0x2f   :  { %v65_v24 = vsub.f32 %v53_v12, %v61_v20 }
  0x30   :  { %v66_v25 = vsub.f32 %v54_v13, %v62_v21  ;;  %v67_v26 = vsub.f32 %v55_v14, %v63_v22  ;;  %v68_v27 = vsub.f32 %v56_v15, %v64_v23 }
  0x31   :  { %v69_v28 = vmul.f32 %v65_v24, %v57_v16 }
  0x32   :  { %v70_v29 = vmul.f32 %v66_v25, %v58_v17  ;;  %v71_v30 = vmul.f32 %v67_v26, %v59_v18  ;;  %v72_v31 = vmul.f32 %v68_v27, %v60_v19 }
  0x33   :  { %v73_v32 = vrot.slane %v69_v28, 4 }
  0x34   :  { %v79_v33 = vrot.slane %v70_v29, 4  ;;  %v85_v34 = vrot.slane %v71_v30, 4  ;;  %v91_v35 = vrot.slane %v72_v31, 4 }
  0x35   :  { %v74_v36 = vadd.f32 %v73_v32, %v69_v28 }
  0x36   :  { %v80_v37 = vadd.f32 %v79_v33, %v70_v29  ;;  %v86_v41 = vadd.f32 %v85_v34, %v71_v30  ;;  %v92_v42 = vadd.f32 %v91_v35, %v72_v31 }
  0x37   :  { %v75_v43 = vrot.slane %v74_v36, 2 }
  0x38   :  { %v81_v44 = vrot.slane %v80_v37, 2  ;;  %v87_v45 = vrot.slane %v86_v41, 2  ;;  %v93_v46 = vrot.slane %v92_v42, 2 }
  0x39   :  { %v76_v47 = vadd.f32 %v75_v43, %v74_v36 }
  0x3a   :  { %v82_v48 = vadd.f32 %v81_v44, %v80_v37  ;;  %v88_v51 = vadd.f32 %v87_v45, %v86_v41  ;;  %v94_v52 = vadd.f32 %v93_v46, %v92_v42 }
  0x3b   :  { %v77_v53 = vrot.slane %v76_v47, 1 }
  0x3c   :  { %v83_v54 = vrot.slane %v82_v48, 1  ;;  %v89_v55 = vrot.slane %v88_v51, 1  ;;  %v95_v56 = vrot.slane %v94_v52, 1 }
  0x3d   :  { %v78_v57 = vadd.f32 %v77_v53, %v76_v47 }
  0x3e   :  { %v84_v58 = vadd.f32 %v83_v54, %v82_v48  ;;  %v90_v60 = vadd.f32 %v89_v55, %v88_v51  ;;  %v96_v61 = vadd.f32 %v95_v56, %v94_v52 }
  0x40   :  { %v105_v62 = vcombine.low %v78_v57, %v84_v58  ;;  %v106_v63 = vcombine.low %v90_v60, %v96_v61 }
  0x42   :  { %v113_v0 = vrot.slane %v105_v62, %v112_v59  ;;  %v120_v1 = vrot.slane %v106_v63, %v112_v59 }
  0x44   :  { %v121_v2 = vcombine.low %v113_v0, %v120_v1 }
  0x46   :  { %v128_v3 = vrot.slane %v121_v2, %v112_v59 }
  0x48   :  { %134 = vst.msk [vmem:[#allocation7] sm:$0xf] %vm132_vm0, %v128_v3 }
  0x49   :  { %210 = shalt.err (!%p207_p6)
}
  0x4a   :  { %s211_s8 = scalar_lea.hbm %s284_s2, 64 }
  0x4b   :  { %p212_p7 = scmp.ne.s32.totalorder %s284_s2, %s211_s8  ;;  %p215_p8 = scmp.lt.u32.totalorder %s211_s8, %s284_s2 }
  0x4d   :  { %p217_p9 = pnand %p215_p8, %p212_p7 }
  0x4f   :  { %220 = shalt.err (!%p217_p9)
}
  0x50   :  { %144 = dma.vmem_to_hbm [thread:$0]  %s142_s4, 64, %s284_s2, [#allocation4]  }
  0x51   :  { %225 = dma.done.wait [#allocation4], 64  }
  0x52   :  { %226 = vsyncadd [#allocation4], 4294967232 }
  0x53   :  { %148 = vsyncpa [#allocation3], 1 }
  0x54   :  { %149 = vsyncpa [#allocation6], 1 }
  0x55   :  { %150 = vsyncpa [#allocation4], 1 }

</bundles_post_ra>
